<compile_context>
chip_gen: v7x
topology: tpu7x:2x2x1
jax: 0.10.0
libtpu: 0.0.40
codegen_flags: <defaults>
</compile_context>

<pallas_src>
import jax
import jax.numpy as jnp
from jax.experimental import pallas as pl
from jax.experimental.pallas import tpu as pltpu


def _round_up(x, m):
    return (x + m - 1) // m * m


def _cdiv(a, b):
    return (a + b - 1) // b


def _conv_matmul_kernel(p_ref, w_ref, b_ref, o_ref):
    # p_ref: (tm, K)   im2col patch tile (K = 9*Cin, unpadded, full-dim block)
    # w_ref: (K, tn)   reshaped conv weight tile
    # b_ref: (1, tn)   f32 bias tile
    # o_ref: (tm, tn)  output tile
    acc = jnp.dot(p_ref[...], w_ref[...], preferred_element_type=jnp.float32)
    o_ref[...] = (acc + b_ref[...]).astype(o_ref.dtype)


def my_downsample(x_nchw, weight, bias, *, tm=1024, compute_dtype=None,
                  data_format="NCHW"):
    """Forward of nn.Conv2d(dim_in, dim_out, 3, stride=2, padding=1).

    x_nchw: (N, Cin, H, W); weight: (Cout, Cin, 3, 3); bias: (Cout,)
    compute_dtype: dtype fed to the MXU; defaults to bfloat16 for f32 inputs.
                   Accumulation and bias add are always f32; output keeps the
                   input dtype.
    data_format: "NCHW" (PyTorch semantics) or "NHWC" (skips the transpose
                 epilogue for channels-last consumers).
    """
    out_dtype = x_nchw.dtype
    if compute_dtype is None:
        compute_dtype = (jnp.bfloat16 if x_nchw.dtype == jnp.float32
                         else x_nchw.dtype)

    N, Cin, H, W = x_nchw.shape
    Cout = weight.shape[0]
    Hout = (H + 2 - 3) // 2 + 1
    Wout = (W + 2 - 3) // 2 + 1

    # ---- glue (XLA): NCHW -> NHWC (cast to compute_dtype), pad, im2col -----
    x = jnp.transpose(x_nchw, (0, 2, 3, 1)).astype(compute_dtype)
    xp = jnp.pad(x, ((0, 0), (1, 1), (1, 1), (0, 0)))
    patches = [xp[:, kh:kh + 2 * Hout:2, kw:kw + 2 * Wout:2, :]
               for kh in range(3) for kw in range(3)]
    # last-dim ordering is [kh][kw][ci] — matches the weight transpose below.
    p = jnp.concatenate(patches, axis=-1).reshape(N * Hout * Wout, 9 * Cin)

    # PyTorch (Cout, Cin, kh, kw) -> (kh, kw, Cin, Cout) -> (9*Cin, Cout)
    w = jnp.transpose(weight, (2, 3, 1, 0)).reshape(9 * Cin, Cout)
    w = w.astype(compute_dtype)

    M, K = p.shape                     # K = 9*Cin, deliberately left unpadded

    # Lane-dense output only when it doesn't blow up the output HBM writes.
    Cp = Cout if Cout <= 32 else _round_up(Cout, 128)
    if Cp != Cout:
        w = jnp.pad(w, ((0, 0), (0, Cp - Cout)))
    b = bias.astype(jnp.float32)
    if Cp != Cout:
        b = jnp.pad(b, (0, Cp - Cout))
    b = b.reshape(1, Cp)

    in_b = jnp.dtype(compute_dtype).itemsize
    out_b = jnp.dtype(out_dtype).itemsize

    # ---- per-generation VMEM budget ----------------------------------------
    try:
        vmem_cap = int(pltpu.get_tpu_info().vmem_capacity_bytes)
    except Exception:                  # query unavailable -> v7x-safe default
        vmem_cap = 64 << 20
    budget = (vmem_cap * 3) // 4       # 96 MiB on v5e/v6e, 48 MiB on v7x

    # ---- tile selection ------------------------------------------------------
    # Clamp tm so the M grid has >= 2 steps whenever possible (keeps both of
    # v7x's TensorCores busy); tm is always a multiple of 8.
    tm_eff = max(8, min(tm, _round_up(_cdiv(M, 2), 8)))

    Kl = _round_up(K, 128)             # lane-padded width of a p tile in VMEM

    def footprint(tm_, tn_):
        tnl = _round_up(tn_, 128)
        return (2 * tm_ * Kl * in_b            # double-buffered patch tiles
                + 2 * _round_up(K, 8) * tnl * in_b   # weight tiles
                + 2 * 8 * tnl * 4                    # bias tiles
                + 2 * tm_ * tnl * out_b              # output tiles
                + (2 << 20))                         # compiler slack

    # Prefer full-Cout tiles (weight streamed once); shrink tm first, only
    # then tile Cout (adds weight re-reads but fits v7x's 64 MiB).
    tn_candidates = [Cp] + [t for t in (512, 256, 128) if t < Cp and Cp % t == 0]
    tm_candidates = []
    t = tm_eff
    while True:
        tm_candidates.append(t)
        if t <= 64:
            break
        t = max(64, _round_up(t // 2, 8))

    tn, tm_sel = tn_candidates[-1], tm_candidates[-1]
    found = False
    for tn_try in tn_candidates:
        for tm_try in tm_candidates:
            if footprint(tm_try, tn_try) <= budget:
                tn, tm_sel = tn_try, tm_try
                found = True
                break
        if found:
            break
    tm_eff = tm_sel

    Mp = _round_up(M, tm_eff)
    if Mp != M:
        p = jnp.pad(p, ((0, Mp - M), (0, 0)))

    grid = (Mp // tm_eff, Cp // tn)    # Cout axis innermost -> p tile reused

    cost = pl.CostEstimate(
        flops=2 * Mp * K * Cp,
        transcendentals=0,
        bytes_accessed=(Mp * K + K * Cp) * in_b + Mp * Cp * out_b + Cp * 4,
    )
    vmem_limit = int(min(vmem_cap, max(budget, footprint(tm_eff, tn) + (4 << 20))))

    out_flat = pl.pallas_call(
        _conv_matmul_kernel,
        out_shape=jax.ShapeDtypeStruct((Mp, Cp), out_dtype),
        grid=grid,
        in_specs=[
            pl.BlockSpec((tm_eff, K), lambda i, j: (i, 0)),   # full-K block
            pl.BlockSpec((K, tn), lambda i, j: (0, j)),
            pl.BlockSpec((1, tn), lambda i, j: (0, j)),
        ],
        out_specs=pl.BlockSpec((tm_eff, tn), lambda i, j: (i, j)),
        compiler_params=pltpu.CompilerParams(
            dimension_semantics=("parallel", "parallel"),
            vmem_limit_bytes=vmem_limit,
        ),
        cost_estimate=cost,
    )(p, w, b)

    # Crop padding (fused with the reshape); skip the NCHW transpose for
    # channels-last consumers.
    out = out_flat
    if Mp != M or Cp != Cout:
        out = out[:M, :Cout]
    out = out.reshape(N, Hout, Wout, Cout)
    if data_format == "NHWC":
        return out
    return jnp.transpose(out, (0, 3, 1, 2))


if __name__ == "__main__":
    key = jax.random.PRNGKey(0)
    k_x, k_w, k_b = jax.random.split(key, 3)

    N, dim_in, H, W = 2, 4, 16, 16
    dim_out = 8

    x = jax.random.normal(k_x, (N, dim_in, H, W), dtype=jnp.float32)
    weight = jax.random.normal(k_w, (dim_out, dim_in, 3, 3), dtype=jnp.float32) * 0.1
    bias = jax.random.normal(k_b, (dim_out,), dtype=jnp.float32) * 0.1

    # Reference: XLA conv with identical semantics to torch Conv2d(3, 2, 1).
    y_ref = jax.lax.conv_general_dilated(
        x, weight, window_strides=(2, 2), padding=((1, 1), (1, 1)),
        dimension_numbers=("NCHW", "OIHW", "NCHW"),
    ) + bias.reshape(1, dim_out, 1, 1)

    # Explicit f32 MXU path — tight tolerance.
    y_f32 = jax.block_until_ready(
        my_downsample(x, weight, bias, compute_dtype=jnp.float32))
    assert y_f32.shape == (N, dim_out, H // 2, W // 2)
    assert jnp.allclose(y_f32, y_ref, atol=1e-4, rtol=1e-4)

    # Default path: bf16 MXU inputs, f32 accumulation — looser tolerance.
    y_bf16 = jax.block_until_ready(my_downsample(x, weight, bias))
    assert y_bf16.shape == (N, dim_out, H // 2, W // 2)
    assert jnp.allclose(y_bf16, y_ref, atol=5e-2, rtol=5e-2)

    # NHWC epilogue path (skips the NCHW transpose).
    y_nhwc = jax.block_until_ready(
        my_downsample(x, weight, bias, data_format="NHWC"))
    assert y_nhwc.shape == (N, H // 2, W // 2, dim_out)
    assert jnp.allclose(jnp.transpose(y_nhwc, (0, 3, 1, 2)), y_bf16)

    print("KERNEL_OK")
</pallas_src>

<mosaic_0001>
module attributes {stable_mosaic.version = 11 : i64} {
  func.func @_conv_matmul_kernel(%arg0: i32, %arg1: i32, %arg2: memref<64x36xf32, #tpu.memory_space<vmem>>, %arg3: memref<36x8xf32, #tpu.memory_space<vmem>>, %arg4: memref<1x8xf32, #tpu.memory_space<vmem>>, %arg5: memref<64x8xf32, #tpu.memory_space<vmem>>) attributes {dimension_semantics = [#tpu.dimension_semantics<parallel>, #tpu.dimension_semantics<parallel>], iteration_bounds = array<i64: 2, 1>, scalar_prefetch = 0 : i64, scratch_operands = 0 : i64, tpu.core_type = #tpu.core_type<tc>, window_params = [{transform_indices = @transform_0, window_bounds = array<i64: 64, 36>}, {transform_indices = @transform_1, window_bounds = array<i64: 36, 8>}, {transform_indices = @transform_2, window_bounds = array<i64: 1, 8>}, {transform_indices = @transform_3, window_bounds = array<i64: 64, 8>}]} {
    %c0 = arith.constant 0 : index
    %c0_0 = arith.constant 0 : index
    %0 = vector.load %arg2[%c0, %c0_0] : memref<64x36xf32, #tpu.memory_space<vmem>>, vector<64x36xf32>
    %c0_1 = arith.constant 0 : index
    %c0_2 = arith.constant 0 : index
    %1 = vector.load %arg3[%c0_1, %c0_2] : memref<36x8xf32, #tpu.memory_space<vmem>>, vector<36x8xf32>
    %cst = arith.constant dense<0.000000e+00> : vector<64x8xf32>
    %2 = tpu.matmul %0, %1, %cst {dimension_numbers = #tpu.dot_dimension_numbers<[1], [0], [0], [1], [0, 0, 1, 1], [], []>} : vector<64x36xf32>, vector<36x8xf32>, vector<64x8xf32> -> vector<64x8xf32>
    %c0_3 = arith.constant 0 : index
    %c0_4 = arith.constant 0 : index
    %3 = vector.load %arg4[%c0_3, %c0_4] : memref<1x8xf32, #tpu.memory_space<vmem>>, vector<1x8xf32>
    %4 = vector.broadcast %3 : vector<1x8xf32> to vector<64x8xf32>
    %5 = arith.addf %2, %4 : vector<64x8xf32>
    %c0_5 = arith.constant 0 : index
    %c0_6 = arith.constant 0 : index
    %6 = vector.load %arg5[%c0_5, %c0_6] : memref<64x8xf32, #tpu.memory_space<vmem>>, vector<64x8xf32>
    tpu.vector_store %arg5[%c0_5, %c0_6], %5 {strides = array<i32>} : memref<64x8xf32, #tpu.memory_space<vmem>>, vector<64x8xf32>,
    return
  }
  func.func @transform_0(%arg0: i32, %arg1: i32) -> (i32, i32) {
    %c0_i32 = arith.constant 0 : i32
    %c0_i32_0 = arith.constant 0 : i32
    return %arg0, %c0_i32 : i32, i32
  }
  func.func @transform_1(%arg0: i32, %arg1: i32) -> (i32, i32) {
    %c0_i32 = arith.constant 0 : i32
    %c0_i32_0 = arith.constant 0 : i32
    return %c0_i32, %arg1 : i32, i32
  }
  func.func @transform_2(%arg0: i32, %arg1: i32) -> (i32, i32) {
    %c0_i32 = arith.constant 0 : i32
    %c0_i32_0 = arith.constant 0 : i32
    return %c0_i32, %arg1 : i32, i32
  }
  func.func @transform_3(%arg0: i32, %arg1: i32) -> (i32, i32) {
    %c0_i32 = arith.constant 0 : i32
    return %arg0, %arg1 : i32, i32
  }
}

</mosaic_0001>

<bundles_post_ra>
// kernel: tpu_custom_call.1
= control target key start
LH: loop header
LB: loop body
LE: loop exit
PB: predicated region body
PF: predicated region fallthrough
CT: control target
= control target key end

     0   :  { %s630_s12 = smov 0   ;;  %s632_s13 = smov 0   ;;  %s704_s0 = inlined_call_operand.vmem [shape: f32[128,36], index: 0, kind: input, shape index: {}]   ;;  %s705_s1 = inlined_call_operand.vmem [shape: f32[36,8], index: 1, kind: input, shape index: {}]   ;;  %s706_s2 = inlined_call_operand.vmem [shape: f32[1,8], index: 2, kind: input, shape index: {}]   ;;  %s707_s3 = inlined_call_operand.vmem [shape: f32[128,8], index: 3, kind: output, shape index: {}]  }
   0x1   :  { %s634_s14 = smov 0  }
   0x2 LB: > { %s25_s15 = sadd.s32 1, %s604_s13  ;;  %p496_p0 = scmp.ge.s32.totalorder %s608_s14, 1  ;;  %s608_s14 = sphi %s634_s14, %s13_s14   ;;  %s604_s13 = sphi %s632_s13, %s709_s13   ;;  %s600_s12 = sphi %s630_s12, %s708_s12  }
   0x3   : > { %p27_p1 = scmp.ge.s32.totalorder %s25_s15, 2  ;;  %p169_p2 = scmp.lt.s32.totalorder %s608_s14, 3 }
   0x5   : > { %s711_s15 = smov (%p27_p1, %s25_s15), 0  ;;  %p170_p3 = pnand %p496_p0, %p169_p2 }
   0x6   : > { %v233_v0 = vld [vmem:[%s705_s1] sm:$0xff] (!%p170_p3)  ;;  %v234_v1 = vld [vmem:[%s705_s1 + $0x8] sm:$0xff] (!%p170_p3)  ;;  %v235_v2 = vld [vmem:[%s705_s1 + $0x10] sm:$0xff] (!%p170_p3)  ;;  %s497_s22 = sshll.u32 (!%p170_p3), %s600_s12, 3  ;;  %vm270_vm0 = vcmask (!%p170_p3), 1043456   ;;  %vm245_vm1 = vcmask (!%p170_p3), 293888  }
   0x7   : > { %173 = sbr.rel (%p170_p3) target bundleno = 240 (0xf0), region = 32  ;;  %v548_v3 = vpack.c.bf16 (!%p170_p3), %v234_v1, %v233_v0  ;;  %v236_v4 = vld [vmem:[%s705_s1 + $0x18] sm:$0xff] (!%p170_p3)  ;;  %p204_p4 = scmp.lt.s32.totalorder (!%p170_p3), %s497_s22, 15  ;;  %v237_v6 = vld [vmem:[%s705_s1 + $0x20] sm:$0xf] (!%p170_p3)  ;;  %vm379_vm2 = vcmask (!%p170_p3), 64512  }
   0x8   : > { %v552_v5 = vpack.c.bf16 (!%p170_p3), %v236_v4, %v235_v2  ;;  %v501_v15 = vld [vmem:[%s706_s2] ss:$0 sm:$0xff] (!%p170_p3) }
   0x9   : > { %549 = vmatprep.subr.bf16.mxu0 (!%p170_p3), %v548_v3  ;;  %556 = vmatprep.subr.bf16.mxu1 (!%p170_p3), %v548_v3 }
   0xa   : > { %551 = vmatpush3.bf16.msra.mxu0 (!%p170_p3), %v548_v3  ;;  %559 = vmatpush3.bf16.msra.mxu1 (!%p170_p3), %v548_v3 }
   0xb   : > { %553 = vmatprep.subr.bf16.mxu0 (!%p170_p3), %v552_v5  ;;  %557 = vmatprep.subr.bf16.mxu1 (!%p170_p3), %v552_v5 }
   0xe   : > { %s713_s22 = smov (!%p204_p4, %s497_s22), 15  ;;  %555 = vmatpush3.bf16.msra.mxu0 %v552_v5  ;;  %560 = vmatpush3.bf16.msra.mxu1 %v552_v5 }
   0xf   : > { %s498_s25 = sshll.u32 %s713_s22, 3  ;;  %534 = vmatprep.subr.msk.mxu0 %vm270_vm0, %v237_v6  ;;  %558 = vmatprep.subr.msk.mxu1 %vm270_vm0, %v237_v6 }
  0x10   : > { %s207_s30 = scalar_lea.vmem %s704_s0, %s498_s25  ;;  %s223_s8 = scalar_lea.vmem %s707_s3, %s498_s25 }
  0x11   : > { %v225_v7 = vld [vmem:[%s207_s30] sm:$0xff]  ;;  %v226_v9 = vld [vmem:[%s207_s30 + $0x8] sm:$0xff]  ;;  %v227_v11 = vld [vmem:[%s207_s30 + $0x10] sm:$0xff] }
  0x12   : > { %v229_v8 = vld [vmem:[%s207_s30 + $0x20] sm:$0xff]  ;;  %536 = vmatprep.mubr.msk.f32.mxu0 %vm245_vm1, %v225_v7  ;;  %v230_v10 = vld [vmem:[%s207_s30 + $0x28] sm:$0xff]  ;;  %v231_v12 = vld [vmem:[%s207_s30 + $0x30] sm:$0xff]  ;;  %535 = vmatpush3.msk.msra.mxu0 %vm270_vm0, %v237_v6 }
  0x13   : > { %542 = vmatprep.mubr.msk.f32.mxu1 %vm245_vm1, %v229_v8  ;;  %561 = vmatpush3.msk.msra.mxu1 %vm270_vm0, %v237_v6  ;;  %v228_v13 = vld [vmem:[%s207_s30 + $0x18] sm:$0xff] }
  0x14   : > { %537 = vmatmul.mubr.msk.f32.vlgmr.msra.gmra.mrb[0].mxu0 %vm245_vm1, %v226_v9  ;;  %543 = vmatmul.mubr.msk.f32.vlgmr.msra.gmra.mrb[0].mxu1 %vm245_vm1, %v230_v10  ;;  %v232_v14 = vld [vmem:[%s207_s30 + $0x38] sm:$0xff] }
  0x15   : > { %539 = vmatprep.mubr.msk.f32.mxu0 %vm245_vm1, %v227_v11  ;;  %545 = vmatprep.mubr.msk.f32.mxu1 %vm245_vm1, %v231_v12 }
  0x18   : > { %540 = vmatmul.mubr.msk.f32.gmra.mrb[2].mxu0 %vm245_vm1, %v228_v13  ;;  %546 = vmatmul.mubr.msk.f32.gmra.mrb[2].mxu1 %vm245_vm1, %v232_v14 }
  0xe7   : > { %v538_v16 = vpop.f32.mrb[0].mxu0  ;;  %v544_v17 = vpop.f32.mrb[0].mxu1 }
  0xe8   : > { %v346_v18 = vadd.f32 %v538_v16, %v501_v15  ;;  %v366_v19 = vadd.f32 %v544_v17, %v501_v15  ;;  %v340_v20 = vpop.f32.mrb[1].mxu0  ;;  %v360_v21 = vpop.f32.mrb[1].mxu1 }
  0xe9   : > { %v341_v22 = vadd.f32 %v501_v15, %v340_v20  ;;  %v361_v23 = vadd.f32 %v501_v15, %v360_v21 }
  0xea   : > { %381 = vst.msk [vmem:[%s223_s8 + $0x8] sm:$0xff] %vm379_vm2, %v346_v18  ;;  %385 = vst.msk [vmem:[%s223_s8 + $0x28] sm:$0xff] %vm379_vm2, %v366_v19 }
  0xeb   : > { %380 = vst.msk [vmem:[%s223_s8] sm:$0xff] %vm379_vm2, %v341_v22  ;;  %384 = vst.msk [vmem:[%s223_s8 + $0x20] sm:$0xff] %vm379_vm2, %v361_v23  ;;  %v541_v24 = vpop.f32.mrb[2].mxu0  ;;  %v547_v25 = vpop.f32.mrb[2].mxu1 }
  0xec   : > { %v356_v26 = vadd.f32 %v541_v24, %v501_v15  ;;  %v376_v27 = vadd.f32 %v547_v25, %v501_v15  ;;  %v350_v28 = vpop.f32.mrb[3].mxu0  ;;  %v370_v29 = vpop.f32.mrb[3].mxu1 }
  0xed   : > { %v351_v30 = vadd.f32 %v501_v15, %v350_v28  ;;  %v371_v31 = vadd.f32 %v501_v15, %v370_v29 }
  0xee   : > { %383 = vst.msk [vmem:[%s223_s8 + $0x18] sm:$0xff] %vm379_vm2, %v356_v26  ;;  %387 = vst.msk [vmem:[%s223_s8 + $0x38] sm:$0xff] %vm379_vm2, %v376_v27 }
  0xef   : > { %382 = vst.msk [vmem:[%s223_s8 + $0x10] sm:$0xff] %vm379_vm2, %v351_v30  ;;  %386 = vst.msk [vmem:[%s223_s8 + $0x30] sm:$0xff] %vm379_vm2, %v371_v31 }
  0xf0 PF: > { %s13_s14 = sadd.s32 1, %s608_s14   ;;  %s708_s12 = smov %s604_s13 }
  0xf1   : > { %p10_p5 = scmp.ge.s32.totalorder %s13_s14, 4   ;;  %s709_s13 = smov %s711_s15 }
  0xf3   :  { %12 = sbr.rel (!%p10_p5) target bundleno = 2 (0x2), region = 68 }

</bundles_post_ra>
